<compile_context>
chip_gen: v6e
topology: v6e:2x2x1
jax: 0.10.0
libtpu: 0.0.40
codegen_flags: <defaults>
</compile_context>

<pallas_src>
import functools

import jax
import jax.numpy as jnp
from jax.experimental import pallas as pl
from jax.experimental.pallas import tpu as pltpu


def _round_up(x, m):
    return ((x + m - 1) // m) * m


def _cdiv(a, b):
    return (a + b - 1) // b


def _pad2d(x, rows, cols):
    if x.shape == (rows, cols):
        return x
    out = jnp.zeros((rows, cols), dtype=x.dtype)
    return out.at[: x.shape[0], : x.shape[1]].set(x)


def _vmem_capacity_bytes():
    try:
        return int(pltpu.get_tpu_info().vmem_capacity_bytes)
    except Exception:
        return 64 * 2 ** 20  # conservative: v7x per-TensorCore VMEM


def _iaf_kernel(z_ref, w1_ref, b1_ref, w23_ref, b23_ref,
                newz_ref, logdet_ref, *, d_real, approx_recip):
    dp = z_ref.shape[1]                       # padded feature dim (x128 lanes)
    z = z_ref[...]                            # (TB, Dp) float32 (kept f32!)
    mx_dtype = w1_ref.dtype                   # bf16 fast path or f32

    # h = relu(z @ W1t + b1) -- f32 accumulation on the MXU.
    h = jnp.dot(z.astype(mx_dtype), w1_ref[...],
                preferred_element_type=jnp.float32) + b1_ref[...]
    h = jnp.maximum(h, 0.0)

    # Fused m/s GEMM: y = h @ [W2t | W3t] + [b2 | b3]  -> (TB, 2*Dp), f32.
    y = jnp.dot(h.astype(mx_dtype), w23_ref[...],
                preferred_element_type=jnp.float32) + b23_ref[...]
    m = y[:, :dp]
    s = y[:, dp:]

    # sigmoid / log-sigmoid sharing a single exponential:
    #   e = exp(-|s|);   sigma = 1/(1+e) if s>=0 else e/(1+e)
    #   log(sigma) = min(s, 0) - log1p(e)
    e = jnp.exp(-jnp.abs(s))
    inv = pl.reciprocal(1.0 + e, approx=approx_recip)
    sigma = jnp.where(s >= 0.0, inv, e * inv)

    # new_z = sigma*z + (1-sigma)*m == m + sigma*(z - m)   (z stays f32)
    newz_ref[...] = (m + sigma * (z - m)).astype(newz_ref.dtype)

    log_sigma = jnp.minimum(s, 0.0) - jnp.log1p(e)
    if d_real < dp:
        # Exclude zero-padded lanes from the per-row sum.
        lane = jax.lax.broadcasted_iota(jnp.int32, log_sigma.shape, 1)
        log_sigma = jnp.where(lane < d_real, log_sigma, 0.0)
    logdet_ref[...] = jnp.sum(log_sigma, axis=1, keepdims=True)


def prepare_iaf_params(w1, b1, w2, b2, w3, b3, *, use_bf16=True):
    """One-time parameter preprocessing (hoisted out of the hot path)."""
    D = w1.shape[0]
    Dp = _round_up(max(D, 128), 128)
    compute_dtype = jnp.bfloat16 if use_bf16 else jnp.float32

    mask = jnp.triu(jnp.ones((D, D), dtype=jnp.float32), k=1)

    def prep_w(w):  # (out,in) -> masked -> (in,out) -> lane-padded
        return _pad2d((w.astype(jnp.float32) * mask).T, Dp, Dp)

    def prep_b(b):
        return _pad2d(b.reshape(1, D).astype(jnp.float32), 1, Dp)

    w1p = prep_w(w1).astype(compute_dtype)
    w23p = jnp.concatenate([prep_w(w2), prep_w(w3)], axis=1).astype(compute_dtype)
    b1p = prep_b(b1)
    b23p = jnp.concatenate([prep_b(b2), prep_b(b3)], axis=1)
    return {"w1p": w1p, "b1p": b1p, "w23p": w23p, "b23p": b23p,
            "d": D, "dp": Dp, "approx_recip": bool(use_bf16)}


def iaf_layer_apply(z, params, *, tb=None):
    """z: (B, D) float; params from prepare_iaf_params."""
    B, D = z.shape
    assert D == params["d"]
    Dp = params["dp"]
    w1p, b1p, w23p, b23p = params["w1p"], params["b1p"], params["w23p"], params["b23p"]
    out_dtype = z.dtype
    wsize = jnp.dtype(w1p.dtype).itemsize
    osize = jnp.dtype(out_dtype).itemsize

    vmem_cap = _vmem_capacity_bytes()
    weights_sb = 3 * Dp * Dp * wsize + 3 * Dp * 4   # single-buffered weights+biases
    # Per-batch-row VMEM: z (f32, x2 buffers) + outputs (x2) + f32 intermediates
    # (h, y(=2*Dp), sigma/e/log_sigma temps).
    row_bytes = 2 * Dp * 4 + 2 * (Dp * osize + 4) + 7 * Dp * 4

    if tb is None:
        cap_rows = 1024 if vmem_cap >= 96 * 2 ** 20 else 512
        budget = int(0.7 * vmem_cap) - weights_sb
        fit_rows = max(8, (budget // row_bytes // 8) * 8) if budget > 8 * row_bytes else 8
        tb = _round_up(max(8, _cdiv(B, 4)), 8)        # aim for >= ~4 grid steps
        tb = int(min(tb, cap_rows, fit_rows))
    tb = max(8, _round_up(int(tb), 8))
    grid = (_cdiv(B, tb),)                            # ragged last tile is masked

    # Lane-pad z only when needed (skip the extra HBM copy for aligned D).
    if Dp == D and z.dtype == jnp.float32:
        zp = z
    else:
        zp = jnp.zeros((B, Dp), jnp.float32).at[:, :D].set(z.astype(jnp.float32))

    cost = pl.CostEstimate(
        flops=2 * B * Dp * Dp + 2 * B * Dp * (2 * Dp),
        transcendentals=2 * B * Dp,
        bytes_accessed=(3 * Dp * Dp * wsize + 3 * Dp * 4
                        + B * Dp * 4 + B * Dp * osize + B * 4),
    )

    kernel = functools.partial(_iaf_kernel, d_real=D,
                               approx_recip=params["approx_recip"])

    # TODO(synk): for Dp >= 512, K-tile both GEMMs (reduction grid axis + f32
    # accumulator) and skip all-zero strictly-triangular weight tiles to save
    # ~2x MXU FLOPs / weight DMA and lift the "weights fully resident" VMEM req.
    def run(single_buffer_weights):
        weight_bufs = 1 if single_buffer_weights else 2
        vmem_need = weight_bufs * weights_sb + tb * row_bytes
        vmem_limit = int(min(max(int(1.3 * vmem_need) + (8 << 20), 32 << 20),
                             int(0.85 * vmem_cap)))
        vmem_limit = int(max(vmem_limit,
                             min(vmem_need + (2 << 20), int(0.95 * vmem_cap))))

        wkw = {"pipeline_mode": pl.Buffered(1)} if single_buffer_weights else {}
        in_specs = [
            pl.BlockSpec((tb, Dp), lambda i: (i, 0)),
            pl.BlockSpec((Dp, Dp), lambda i: (0, 0), **wkw),
            pl.BlockSpec((1, Dp), lambda i: (0, 0), **wkw),
            pl.BlockSpec((Dp, 2 * Dp), lambda i: (0, 0), **wkw),
            pl.BlockSpec((1, 2 * Dp), lambda i: (0, 0), **wkw),
        ]
        out_specs = (
            pl.BlockSpec((tb, Dp), lambda i: (i, 0)),
            pl.BlockSpec((tb, 1), lambda i: (i, 0)),
        )
        return pl.pallas_call(
            kernel,
            out_shape=(jax.ShapeDtypeStruct((B, Dp), out_dtype),
                       jax.ShapeDtypeStruct((B, 1), jnp.float32)),
            grid=grid,
            in_specs=in_specs,
            out_specs=out_specs,
            compiler_params=pltpu.CompilerParams(
                dimension_semantics=("parallel",),
                vmem_limit_bytes=vmem_limit,
            ),
            cost_estimate=cost,
        )(zp, w1p, b1p, w23p, b23p)

    try:
        new_z_p, logdet_p = run(True)
    except Exception:
        # Fallback if this JAX build rejects pl.Buffered(1) single-buffering.
        new_z_p, logdet_p = run(False)

    new_z = new_z_p if Dp == D else new_z_p[:, :D]
    return new_z, logdet_p[:, 0]


def iaf_layer_pallas(z, w1, b1, w2, b2, w3, b3, *, use_bf16=True, tb=None):
    """Convenience one-shot wrapper (prefer hoisting prepare_iaf_params)."""
    params = prepare_iaf_params(w1, b1, w2, b2, w3, b3, use_bf16=use_bf16)
    return iaf_layer_apply(z, params, tb=tb)


def iaf_layer_ref(z, w1, b1, w2, b2, w3, b3):
    """Pure-JAX reference mirroring the PyTorch forward."""
    D = z.shape[1]
    mask = jnp.triu(jnp.ones((D, D), dtype=z.dtype), k=1)
    h = jax.nn.relu(z @ (w1 * mask).T + b1)
    m = h @ (w2 * mask).T + b2
    s = h @ (w3 * mask).T + b3
    sigma = jax.nn.sigmoid(s)
    new_z = sigma * z + (1.0 - sigma) * m
    logdet = jnp.sum(jnp.log(sigma), axis=1)
    return new_z, logdet


if __name__ == "__main__":
    B, D = 64, 32  # small shapes; D is lane-padded to 128 inside the wrapper

    key = jax.random.PRNGKey(0)
    kz, k1, k2, k3, kb1, kb2, kb3 = jax.random.split(key, 7)

    z = jax.random.normal(kz, (B, D), dtype=jnp.float32)
    # PyTorch Linear shapes: weight (out, in), bias (out,)
    w1 = 0.1 * jax.random.normal(k1, (D, D), dtype=jnp.float32)
    w2 = 0.1 * jax.random.normal(k2, (D, D), dtype=jnp.float32)
    w3 = 0.1 * jax.random.normal(k3, (D, D), dtype=jnp.float32)
    b1 = 0.1 * jax.random.normal(kb1, (D,), dtype=jnp.float32)
    b2 = 0.1 * jax.random.normal(kb2, (D,), dtype=jnp.float32)
    b3 = 0.1 * jax.random.normal(kb3, (D,), dtype=jnp.float32)

    ref_new_z, ref_logdet = iaf_layer_ref(z, w1, b1, w2, b2, w3, b3)

    # 1) f32 path (exact reciprocal), params hoisted, tb=16 -> 4 grid steps.
    p32 = prepare_iaf_params(w1, b1, w2, b2, w3, b3, use_bf16=False)
    new_z, logdet = iaf_layer_apply(z, p32, tb=16)
    jax.block_until_ready((new_z, logdet))
    assert new_z.shape == (B, D) and logdet.shape == (B,)
    assert jnp.allclose(new_z, ref_new_z, atol=1e-4, rtol=1e-4)
    assert jnp.allclose(logdet, ref_logdet, atol=1e-4, rtol=1e-4)

    # 2) default fast path: bf16 MXU operands + approx reciprocal (f32 blend).
    new_z16, logdet16 = iaf_layer_pallas(z, w1, b1, w2, b2, w3, b3)
    jax.block_until_ready((new_z16, logdet16))
    assert new_z16.shape == (B, D) and logdet16.shape == (B,)
    assert bool(jnp.all(jnp.isfinite(new_z16))) and bool(jnp.all(jnp.isfinite(logdet16)))
    assert jnp.allclose(new_z16, ref_new_z, atol=5e-2, rtol=5e-2)
    assert jnp.allclose(logdet16, ref_logdet, atol=2e-1, rtol=5e-2)

    print("KERNEL_OK")
</pallas_src>

<mosaic_0001>
module attributes {stable_mosaic.version = 11 : i64} {
  func.func @_iaf_kernel(%arg0: i32, %arg1: memref<16x128xf32, #tpu.memory_space<vmem>>, %arg2: memref<128x128xf32, #tpu.memory_space<vmem>>, %arg3: memref<1x128xf32, #tpu.memory_space<vmem>>, %arg4: memref<128x256xf32, #tpu.memory_space<vmem>>, %arg5: memref<1x256xf32, #tpu.memory_space<vmem>>, %arg6: memref<16x128xf32, #tpu.memory_space<vmem>>, %arg7: memref<16x1xf32, #tpu.memory_space<vmem>>) attributes {dimension_semantics = [#tpu.dimension_semantics<parallel>], iteration_bounds = array<i64: 4>, scalar_prefetch = 0 : i64, scratch_operands = 0 : i64, tpu.core_type = #tpu.core_type<tc>, window_params = [{transform_indices = @transform_0, window_bounds = array<i64: 16, 128>}, {pipeline_mode = #tpu.pipeline_mode<synchronous>, transform_indices = @transform_1, window_bounds = array<i64: 128, 128>}, {pipeline_mode = #tpu.pipeline_mode<synchronous>, transform_indices = @transform_2, window_bounds = array<i64: 1, 128>}, {pipeline_mode = #tpu.pipeline_mode<synchronous>, transform_indices = @transform_3, window_bounds = array<i64: 128, 256>}, {pipeline_mode = #tpu.pipeline_mode<synchronous>, transform_indices = @transform_4, window_bounds = array<i64: 1, 256>}, {transform_indices = @transform_5, window_bounds = array<i64: 16, 128>}, {transform_indices = @transform_6, window_bounds = array<i64: 16, 1>}]} {
    %c0 = arith.constant 0 : index
    %c0_0 = arith.constant 0 : index
    %0 = vector.load %arg1[%c0, %c0_0] : memref<16x128xf32, #tpu.memory_space<vmem>>, vector<16x128xf32>
    %c0_1 = arith.constant 0 : index
    %c0_2 = arith.constant 0 : index
    %1 = vector.load %arg2[%c0_1, %c0_2] : memref<128x128xf32, #tpu.memory_space<vmem>>, vector<128x128xf32>
    %cst = arith.constant dense<0.000000e+00> : vector<16x128xf32>
    %2 = tpu.matmul %0, %1, %cst {dimension_numbers = #tpu.dot_dimension_numbers<[1], [0], [0], [1], [0, 0, 1, 1], [], []>} : vector<16x128xf32>, vector<128x128xf32>, vector<16x128xf32> -> vector<16x128xf32>
    %c0_3 = arith.constant 0 : index
    %c0_4 = arith.constant 0 : index
    %3 = vector.load %arg3[%c0_3, %c0_4] : memref<1x128xf32, #tpu.memory_space<vmem>>, vector<1x128xf32>
    %4 = vector.broadcast %3 : vector<1x128xf32> to vector<16x128xf32>
    %5 = arith.addf %2, %4 : vector<16x128xf32>
    %cst_5 = arith.constant 0.000000e+00 : f32
    %6 = vector.broadcast %cst_5 : f32 to vector<16x128xf32>
    %7 = arith.maximumf %5, %6 : vector<16x128xf32>
    %c0_6 = arith.constant 0 : index
    %c0_7 = arith.constant 0 : index
    %8 = vector.load %arg4[%c0_6, %c0_7] : memref<128x256xf32, #tpu.memory_space<vmem>>, vector<128x256xf32>
    %cst_8 = arith.constant dense<0.000000e+00> : vector<16x256xf32>
    %9 = tpu.matmul %7, %8, %cst_8 {dimension_numbers = #tpu.dot_dimension_numbers<[1], [0], [0], [1], [0, 0, 1, 1], [], []>} : vector<16x128xf32>, vector<128x256xf32>, vector<16x256xf32> -> vector<16x256xf32>
    %c0_9 = arith.constant 0 : index
    %c0_10 = arith.constant 0 : index
    %10 = vector.load %arg5[%c0_9, %c0_10] : memref<1x256xf32, #tpu.memory_space<vmem>>, vector<1x256xf32>
    %11 = vector.broadcast %10 : vector<1x256xf32> to vector<16x256xf32>
    %12 = arith.addf %9, %11 : vector<16x256xf32>
    %13 = vector.extract_strided_slice %12 {offsets = [0, 0], sizes = [16, 128], strides = [1, 1]} : vector<16x256xf32> to vector<16x128xf32>
    %14 = vector.extract_strided_slice %12 {offsets = [0, 128], sizes = [16, 128], strides = [1, 1]} : vector<16x256xf32> to vector<16x128xf32>
    %15 = math.absf %14 : vector<16x128xf32>
    %cst_11 = arith.constant 0.000000e+00 : f32
    %16 = vector.broadcast %cst_11 : f32 to vector<16x128xf32>
    %17 = arith.subf %16, %15 : vector<16x128xf32>
    %18 = math.exp %17 : vector<16x128xf32>
    %cst_12 = arith.constant 1.000000e+00 : f32
    %19 = vector.broadcast %cst_12 : f32 to vector<16x128xf32>
    %20 = arith.addf %19, %18 : vector<16x128xf32>
    %21 = tpu.reciprocal %20 : vector<16x128xf32> -> vector<16x128xf32>
    %cst_13 = arith.constant 0.000000e+00 : f32
    %22 = vector.broadcast %cst_13 : f32 to vector<16x128xf32>
    %23 = arith.cmpf oge, %14, %22 : vector<16x128xf32>
    %24 = arith.mulf %18, %21 : vector<16x128xf32>
    %25 = arith.select %23, %21, %24 : vector<16x128xi1>, vector<16x128xf32>
    %26 = arith.subf %0, %13 : vector<16x128xf32>
    %27 = arith.mulf %25, %26 : vector<16x128xf32>
    %28 = arith.addf %13, %27 : vector<16x128xf32>
    %c0_14 = arith.constant 0 : index
    %c0_15 = arith.constant 0 : index
    %29 = vector.load %arg6[%c0_14, %c0_15] : memref<16x128xf32, #tpu.memory_space<vmem>>, vector<16x128xf32>
    tpu.vector_store %arg6[%c0_14, %c0_15], %28 {strides = array<i32>} : memref<16x128xf32, #tpu.memory_space<vmem>>, vector<16x128xf32>,
    %cst_16 = arith.constant 0.000000e+00 : f32
    %30 = vector.broadcast %cst_16 : f32 to vector<16x128xf32>
    %31 = arith.minimumf %14, %30 : vector<16x128xf32>
    %32 = math.log1p %18 : vector<16x128xf32>
    %33 = arith.subf %31, %32 : vector<16x128xf32>
    %34 = tpu.iota {dimensions = array<i32: 1>} : vector<16x128xi32>
    %c32_i32 = arith.constant 32 : i32
    %35 = vector.broadcast %c32_i32 : i32 to vector<16x128xi32>
    %36 = arith.cmpi slt, %34, %35 : vector<16x128xi32>
    %cst_17 = arith.constant 0.000000e+00 : f32
    %37 = vector.broadcast %cst_17 : f32 to vector<16x128xf32>
    %38 = arith.select %36, %33, %37 : vector<16x128xi1>, vector<16x128xf32>
    %cst_18 = arith.constant dense<0.000000e+00> : vector<16xf32>
    %39 = vector.multi_reduction <add>, %38, %cst_18 [1] : vector<16x128xf32> to vector<16xf32>
    %40 = vector.shape_cast %39 : vector<16xf32> to vector<16x1xf32>
    %c0_19 = arith.constant 0 : index
    %c0_20 = arith.constant 0 : index
    %41 = vector.load %arg7[%c0_19, %c0_20] : memref<16x1xf32, #tpu.memory_space<vmem>>, vector<16x1xf32>
    tpu.vector_store %arg7[%c0_19, %c0_20], %40 {strides = array<i32>} : memref<16x1xf32, #tpu.memory_space<vmem>>, vector<16x1xf32>,
    return
  }
  func.func @transform_0(%arg0: i32) -> (i32, i32) {
    %c0_i32 = arith.constant 0 : i32
    %c0_i32_0 = arith.constant 0 : i32
    return %arg0, %c0_i32 : i32, i32
  }
  func.func @transform_1(%arg0: i32) -> (i32, i32) {
    %c0_i32 = arith.constant 0 : i32
    %c0_i32_0 = arith.constant 0 : i32
    %c0_i32_1 = arith.constant 0 : i32
    return %c0_i32, %c0_i32_0 : i32, i32
  }
  func.func @transform_2(%arg0: i32) -> (i32, i32) {
    %c0_i32 = arith.constant 0 : i32
    %c0_i32_0 = arith.constant 0 : i32
    %c0_i32_1 = arith.constant 0 : i32
    return %c0_i32, %c0_i32_0 : i32, i32
  }
  func.func @transform_3(%arg0: i32) -> (i32, i32) {
    %c0_i32 = arith.constant 0 : i32
    %c0_i32_0 = arith.constant 0 : i32
    %c0_i32_1 = arith.constant 0 : i32
    return %c0_i32, %c0_i32_0 : i32, i32
  }
  func.func @transform_4(%arg0: i32) -> (i32, i32) {
    %c0_i32 = arith.constant 0 : i32
    %c0_i32_0 = arith.constant 0 : i32
    %c0_i32_1 = arith.constant 0 : i32
    return %c0_i32, %c0_i32_0 : i32, i32
  }
  func.func @transform_5(%arg0: i32) -> (i32, i32) {
    %c0_i32 = arith.constant 0 : i32
    %c0_i32_0 = arith.constant 0 : i32
    return %arg0, %c0_i32 : i32, i32
  }
  func.func @transform_6(%arg0: i32) -> (i32, i32) {
    %c0_i32 = arith.constant 0 : i32
    %c0_i32_0 = arith.constant 0 : i32
    return %arg0, %c0_i32 : i32, i32
  }
}

module attributes {stable_mosaic.version = 11 : i64} {
  func.func @_iaf_kernel(%arg0: i32, %arg1: memref<16x128xf32, #tpu.memory_space<vmem>>, %arg2: memref<128x128xf32, #tpu.memory_space<vmem>>, %arg3: memref<1x128xf32, #tpu.memory_space<vmem>>, %arg4: memref<128x256xf32, #tpu.memory_space<vmem>>, %arg5: memref<1x256xf32, #tpu.memory_space<vmem>>, %arg6: memref<16x128xf32, #tpu.memory_space<vmem>>, %arg7: memref<16x1xf32, #tpu.memory_space<vmem>>) attributes {dimension_semantics = [#tpu.dimension_semantics<parallel>], iteration_bounds = array<i64: 4>, scalar_prefetch = 0 : i64, scratch_operands = 0 : i64, tpu.core_type = #tpu.core_type<tc>, window_params = [{transform_indices = @transform_0, window_bounds = array<i64: 16, 128>}, {pipeline_mode = #tpu.pipeline_mode<synchronous>, transform_indices = @transform_1, window_bounds = array<i64: 128, 128>}, {pipeline_mode = #tpu.pipeline_mode<synchronous>, transform_indices = @transform_2, window_bounds = array<i64: 1, 128>}, {pipeline_mode = #tpu.pipeline_mode<synchronous>, transform_indices = @transform_3, window_bounds = array<i64: 128, 256>}, {pipeline_mode = #tpu.pipeline_mode<synchronous>, transform_indices = @transform_4, window_bounds = array<i64: 1, 256>}, {transform_indices = @transform_5, window_bounds = array<i64: 16, 128>}, {transform_indices = @transform_6, window_bounds = array<i64: 16, 1>}]} {
    %c0 = arith.constant 0 : index
    %c0_0 = arith.constant 0 : index
    %0 = vector.load %arg1[%c0, %c0_0] : memref<16x128xf32, #tpu.memory_space<vmem>>, vector<16x128xf32>
    %c0_1 = arith.constant 0 : index
    %c0_2 = arith.constant 0 : index
    %1 = vector.load %arg2[%c0_1, %c0_2] : memref<128x128xf32, #tpu.memory_space<vmem>>, vector<128x128xf32>
    %cst = arith.constant dense<0.000000e+00> : vector<16x128xf32>
    %2 = tpu.matmul %0, %1, %cst {dimension_numbers = #tpu.dot_dimension_numbers<[1], [0], [0], [1], [0, 0, 1, 1], [], []>} : vector<16x128xf32>, vector<128x128xf32>, vector<16x128xf32> -> vector<16x128xf32>
    %c0_3 = arith.constant 0 : index
    %c0_4 = arith.constant 0 : index
    %3 = vector.load %arg3[%c0_3, %c0_4] : memref<1x128xf32, #tpu.memory_space<vmem>>, vector<1x128xf32>
    %4 = vector.broadcast %3 : vector<1x128xf32> to vector<16x128xf32>
    %5 = arith.addf %2, %4 : vector<16x128xf32>
    %cst_5 = arith.constant 0.000000e+00 : f32
    %6 = vector.broadcast %cst_5 : f32 to vector<16x128xf32>
    %7 = arith.maximumf %5, %6 : vector<16x128xf32>
    %c0_6 = arith.constant 0 : index
    %c0_7 = arith.constant 0 : index
    %8 = vector.load %arg4[%c0_6, %c0_7] : memref<128x256xf32, #tpu.memory_space<vmem>>, vector<128x256xf32>
    %cst_8 = arith.constant dense<0.000000e+00> : vector<16x256xf32>
    %9 = tpu.matmul %7, %8, %cst_8 {dimension_numbers = #tpu.dot_dimension_numbers<[1], [0], [0], [1], [0, 0, 1, 1], [], []>} : vector<16x128xf32>, vector<128x256xf32>, vector<16x256xf32> -> vector<16x256xf32>
    %c0_9 = arith.constant 0 : index
    %c0_10 = arith.constant 0 : index
    %10 = vector.load %arg5[%c0_9, %c0_10] : memref<1x256xf32, #tpu.memory_space<vmem>>, vector<1x256xf32>
    %11 = vector.broadcast %10 : vector<1x256xf32> to vector<16x256xf32>
    %12 = arith.addf %9, %11 : vector<16x256xf32>
    %13 = vector.extract_strided_slice %12 {offsets = [0, 0], sizes = [16, 128], strides = [1, 1]} : vector<16x256xf32> to vector<16x128xf32>
    %14 = vector.extract_strided_slice %12 {offsets = [0, 128], sizes = [16, 128], strides = [1, 1]} : vector<16x256xf32> to vector<16x128xf32>
    %15 = math.absf %14 : vector<16x128xf32>
    %cst_11 = arith.constant 0.000000e+00 : f32
    %16 = vector.broadcast %cst_11 : f32 to vector<16x128xf32>
    %17 = arith.subf %16, %15 : vector<16x128xf32>
    %18 = math.exp %17 : vector<16x128xf32>
    %cst_12 = arith.constant 1.000000e+00 : f32
    %19 = vector.broadcast %cst_12 : f32 to vector<16x128xf32>
    %20 = arith.addf %19, %18 : vector<16x128xf32>
    %21 = tpu.reciprocal %20 : vector<16x128xf32> -> vector<16x128xf32>
    %cst_13 = arith.constant 0.000000e+00 : f32
    %22 = vector.broadcast %cst_13 : f32 to vector<16x128xf32>
    %23 = arith.cmpf oge, %14, %22 : vector<16x128xf32>
    %24 = arith.mulf %18, %21 : vector<16x128xf32>
    %25 = arith.select %23, %21, %24 : vector<16x128xi1>, vector<16x128xf32>
    %26 = arith.subf %0, %13 : vector<16x128xf32>
    %27 = arith.mulf %25, %26 : vector<16x128xf32>
    %28 = arith.addf %13, %27 : vector<16x128xf32>
    %c0_14 = arith.constant 0 : index
    %c0_15 = arith.constant 0 : index
    %29 = vector.load %arg6[%c0_14, %c0_15] : memref<16x128xf32, #tpu.memory_space<vmem>>, vector<16x128xf32>
    tpu.vector_store %arg6[%c0_14, %c0_15], %28 {strides = array<i32>} : memref<16x128xf32, #tpu.memory_space<vmem>>, vector<16x128xf32>,
    %cst_16 = arith.constant 0.000000e+00 : f32
    %30 = vector.broadcast %cst_16 : f32 to vector<16x128xf32>
    %31 = arith.minimumf %14, %30 : vector<16x128xf32>
    %32 = math.log1p %18 : vector<16x128xf32>
    %33 = arith.subf %31, %32 : vector<16x128xf32>
    %34 = tpu.iota {dimensions = array<i32: 1>} : vector<16x128xi32>
    %c32_i32 = arith.constant 32 : i32
    %35 = vector.broadcast %c32_i32 : i32 to vector<16x128xi32>
    %36 = arith.cmpi slt, %34, %35 : vector<16x128xi32>
    %cst_17 = arith.constant 0.000000e+00 : f32
    %37 = vector.broadcast %cst_17 : f32 to vector<16x128xf32>
    %38 = arith.select %36, %33, %37 : vector<16x128xi1>, vector<16x128xf32>
    %cst_18 = arith.constant dense<0.000000e+00> : vector<16xf32>
    %39 = vector.multi_reduction <add>, %38, %cst_18 [1] : vector<16x128xf32> to vector<16xf32>
    %40 = vector.shape_cast %39 : vector<16xf32> to vector<16x1xf32>
    %c0_19 = arith.constant 0 : index
    %c0_20 = arith.constant 0 : index
    %41 = vector.load %arg7[%c0_19, %c0_20] : memref<16x1xf32, #tpu.memory_space<vmem>>, vector<16x1xf32>
    tpu.vector_store %arg7[%c0_19, %c0_20], %40 {strides = array<i32>} : memref<16x1xf32, #tpu.memory_space<vmem>>, vector<16x1xf32>,
    return
  }
  func.func @transform_0(%arg0: i32) -> (i32, i32) {
    %c0_i32 = arith.constant 0 : i32
    %c0_i32_0 = arith.constant 0 : i32
    return %arg0, %c0_i32 : i32, i32
  }
  func.func @transform_1(%arg0: i32) -> (i32, i32) {
    %c0_i32 = arith.constant 0 : i32
    %c0_i32_0 = arith.constant 0 : i32
    %c0_i32_1 = arith.constant 0 : i32
    return %c0_i32, %c0_i32_0 : i32, i32
  }
  func.func @transform_2(%arg0: i32) -> (i32, i32) {
    %c0_i32 = arith.constant 0 : i32
    %c0_i32_0 = arith.constant 0 : i32
    %c0_i32_1 = arith.constant 0 : i32
    return %c0_i32, %c0_i32_0 : i32, i32
  }
  func.func @transform_3(%arg0: i32) -> (i32, i32) {
    %c0_i32 = arith.constant 0 : i32
    %c0_i32_0 = arith.constant 0 : i32
    %c0_i32_1 = arith.constant 0 : i32
    return %c0_i32, %c0_i32_0 : i32, i32
  }
  func.func @transform_4(%arg0: i32) -> (i32, i32) {
    %c0_i32 = arith.constant 0 : i32
    %c0_i32_0 = arith.constant 0 : i32
    %c0_i32_1 = arith.constant 0 : i32
    return %c0_i32, %c0_i32_0 : i32, i32
  }
  func.func @transform_5(%arg0: i32) -> (i32, i32) {
    %c0_i32 = arith.constant 0 : i32
    %c0_i32_0 = arith.constant 0 : i32
    return %arg0, %c0_i32 : i32, i32
  }
  func.func @transform_6(%arg0: i32) -> (i32, i32) {
    %c0_i32 = arith.constant 0 : i32
    %c0_i32_0 = arith.constant 0 : i32
    return %arg0, %c0_i32 : i32, i32
  }
}

</mosaic_0001>

<bundles_post_ra>
// kernel: tpu_custom_call.1
= control target key start
LH: loop header
LB: loop body
LE: loop exit
PB: predicated region body
PF: predicated region fallthrough
CT: control target
= control target key end

     0   :  { %12 = vsyncpa [#allocation3], 0  ;;  %s1316_s0 = inlined_call_operand.hbm [shape: f32[64,128], index: 0, kind: input, shape index: {}]   ;;  %s1317_s1 = inlined_call_operand.hbm [shape: f32[128,128], index: 1, kind: input, shape index: {}]   ;;  %s1318_s2 = inlined_call_operand.vmem [shape: f32[1,128], index: 2, kind: input, shape index: {}]   ;;  %s1319_s3 = inlined_call_operand.hbm [shape: f32[128,256], index: 3, kind: input, shape index: {}]   ;;  %s1320_s4 = inlined_call_operand.vmem [shape: f32[1,256], index: 4, kind: input, shape index: {}]   ;;  %s1321_s5 = inlined_call_operand.hbm [shape: f32[64,128], index: 5, kind: output, shape index: {0}]   ;;  %s1322_s6 = inlined_call_operand.vmem [shape: f32[64,1], index: 6, kind: output, shape index: {1}]  }
   0x1   :  { %14 = vsyncpa [#allocation3 + $0x1], 0 }
   0x2   :  { %15 = vsyncpa [#allocation6], 0 }
   0x3   :  { %16 = vsyncpa [#allocation4], 0 }
   0x4   :  { %18 = vsyncpa [#allocation4 + $0x1], 0  ;;  %s1096_s21 = smov 0   ;;  %s1098_s22 = smov 0  }
   0x5   :  { %s1100_s23 = smov 0   ;;  %s1102_s24 = smov 0  }
   0x6 LB: > { %s1117_s25 = sadd.s32 4294967295, %s1048_s24   ;;  %s738_s26 = sadd.s32 4294967294, %s1048_s24   ;;  %s1048_s24 = sphi %s1102_s24, %s1346_s24   ;;  %s1044_s23 = sphi %s1100_s23, %s1345_s23   ;;  %s1040_s22 = sphi %s1098_s22, %s1344_s22   ;;  %s1036_s21 = sphi %s1096_s21, %s1343_s21  }
   0x7   : > { %p44_p0 = scmp.ne.s32.totalorder %s1040_s22, %s1036_s21  ;;  %p1323_p1 = scmp.eq.s32.totalorder %s1117_s25, 0 }
   0x8   : > { %p152_p2 = scmp.eq.s32.totalorder %s1117_s25, 3  ;;  %p158_p3 = scmp.eq.s32.totalorder %s738_s26, 3 }
   0x9   : > { %p1126_p4 = por %p1323_p1, %p44_p0  ;;  %p739_p5 = scmp.ge.s32.totalorder %s1048_s24, 1 }
   0xa   : > { %p1131_p6 = por %p158_p3, %p44_p0  ;;  %p191_p7 = scmp.lt.s32.totalorder %s1048_s24, 5 }
   0xb   : > { %s1329_s27 = scalar_select %p1126_p4, 1, 0 }
   0xc   : > { %s1330_s28 = scalar_select %p1131_p6, 1, 0 }
   0xd   : > { %p1136_p8 = pnand %p739_p5, %p191_p7  ;;  %s1050_s30 = smov [#allocation5]  }
   0xe   : > { %s203_s7 = sshll.u32 %s1050_s30, 4  ;;  %s1051_s9 = smov [#allocation7]   ;;  %s204_s7 = int_to_ptr.vmem [resolvable:$true] %s203_s7 }
   0xf   : > { %s1331_s29 = scalar_select %p1136_p8, 1, 0 }
  0x10   : > { %p826_p9 = pneg %p1136_p8  ;;  %s219_s10 = sshll.u32 %s1051_s9, 4  ;;  %s220_s10 = int_to_ptr.vmem [resolvable:$true] %s219_s10 }
  0x11   : > { %s911_s11 = scalar_lea.vmem %s204_s7, 2048  ;;  %p919_p3 = scmp.lt.s32.totalorder %s204_s7, %s204_s7 }
  0x12   : > { %p1144_p10 = pnand %p826_p9, %p1323_p1  ;;  %p912_p12 = scmp.ne.s32.totalorder %s204_s7, %s911_s11 }
  0x13   : > { %p920_p5 = scmp.lt.s32.totalorder %s911_s11, %s911_s11 }
  0x14   : > { %p902_p11 = pneg %p1144_p10 }
  0x15   : > { %p921_p7 = por %p920_p5, %p919_p3 }
  0x16   : > { %p914_p13 = pnand %p912_p12, %p902_p11 }
  0x18   : > { %p915_p0 = pneg %p914_p13 }
  0x1a   : > { %p922_p9 = pnand %p921_p7, %p915_p0 }
  0x1c   : > { %925 = shalt.err (!%p922_p9)
}
  0x1d   : > { %s1324_s12 = smov 128   ;;  %s1325_s13 = smov 8  }
  0x1e   : > { %829 = dma.hbm_to_vmem [thread:$0]  (!%p1144_p10), %s1317_s1, 2048, %s204_s7, [#allocation6], %s1324_s12, %s1324_s12, %s1325_s13  }
  0x1f   : > { %s937_s16 = scalar_lea.vmem %s220_s10, 4096  ;;  %p945_p0 = scmp.lt.s32.totalorder %s220_s10, %s220_s10 }
  0x20   : > { %p938_p12 = scmp.ne.s32.totalorder %s220_s10, %s937_s16  ;;  %p946_p5 = scmp.lt.s32.totalorder %s937_s16, %s937_s16 }
  0x22   : > { %p940_p13 = pnand %p938_p12, %p902_p11  ;;  %p947_p7 = por %p946_p5, %p945_p0 }
  0x24   : > { %p941_p3 = pneg %p940_p13 }
  0x26   : > { %p948_p9 = pnand %p947_p7, %p941_p3 }
  0x28   : > { %951 = shalt.err (!%p948_p9)
}
  0x29   : > { %s1054_s17 = smov 256   ;;  %s1055_s18 = smov 16  }
  0x2a   : > { %832 = dma.hbm_to_vmem [thread:$0]  (!%p1144_p10), %s1319_s3, 4096, %s220_s10, [#allocation6], %s1054_s17, %s1054_s17, %s1055_s18  }
  0x2b   : > { %s1170_s26 = sadd.s32 1, %s1048_s24   ;;  %s31_s7 = sadd.s32 1, %s1044_s23 }
  0x2c   : > { %s28_s30 = ssub.s32 %s1048_s24, %s1170_s26  ;;  %p38_p12 = scmp.ne.s32.totalorder %s1044_s23, %s1040_s22 }
  0x2d   : > { %p29_p11 = scmp.eq.s32.totalorder %s28_s30, 0  ;;  %p39_p13 = scmp.eq.s32.totalorder %s1048_s24, 0 }
  0x2e   : > { %p1183_p0 = por %p152_p2, %p38_p12  ;;  %p843_p5 = scmp.lt.s32.totalorder %s1048_s24, 4 }
  0x2f   : > { %s1179_s9 = scalar_select %p29_p11, %s1044_s23, %s31_s7  }
  0x30   : > { %p40_p3 = por %p39_p13, %p38_p12  ;;  %s236_s8 = sand.u32 1, %s1044_s23  }
  0x31   : > { %s1333_s11 = scalar_select %p1183_p0, 1, 0 }
  0x32   : > { %s743_s14 = sshll.u32 %s236_s8, 4  ;;  %s759_s10 = sshll.u32 %s1048_s24, 8 }
  0x33   : > { %s1193_s17 = scalar_lea.hbm %s1316_s0, %s759_s10  ;;  %s240_s18 = scalar_lea.vmem [#allocation2], %s743_s14 }
  0x34   : > { %s247_s19 = sshll.u32 %s240_s18, 4  ;;  %p1197_p2 = pnand %p843_p5, %p40_p3  ;;  %s1195_s19 = int_to_ptr.vmem [resolvable:$true] %s247_s19 }
  0x35   : > { %s1201_s30 = scalar_lea.sflag [#allocation3], %s236_s8  ;;  %s952_s7 = scalar_lea.hbm %s1193_s17, 256 }
  0x36   : > { %p953_p10 = scmp.ne.s32.totalorder %s1193_s17, %s952_s7  ;;  %p954_p7 = pneg %p1197_p2 }
  0x37   : > { %s957_s14 = scalar_lea.hbm %s1316_s0, 1024  ;;  %p958_p12 = scmp.lt.s32.totalorder %s1193_s17, %s1316_s0 }
  0x38   : > { %p955_p9 = pnand %p954_p7, %p953_p10  ;;  %p959_p13 = scmp.lt.s32.totalorder %s957_s14, %s952_s7 }
  0x3a   : > { %p956_p11 = pneg %p955_p9  ;;  %p960_p3 = por %p959_p13, %p958_p12 }
  0x3c   : > { %p961_p5 = pnand %p960_p3, %p956_p11 }
  0x3e   : > { %964 = shalt.err (!%p961_p5)
}
  0x3f   : > { %s965_s8 = scalar_lea.vmem %s1195_s19, 256  ;;  %s1056_s12 = smov [#allocation2]  }
  0x40   : > { %p966_p1 = scmp.ne.s32.totalorder %s1195_s19, %s965_s8  ;;  %s970_s13 = sshll.u32 %s1056_s12, 4  ;;  %s971_s13 = int_to_ptr.vmem [resolvable:$false] %s970_s13 }
  0x41   : > { %s972_s10 = scalar_lea.vmem %s971_s13, 512  ;;  %p973_p9 = scmp.lt.s32.totalorder %s1195_s19, %s971_s13 }
  0x42   : > { %p968_p6 = pnand %p966_p1, %p954_p7  ;;  %p974_p0 = scmp.lt.s32.totalorder %s972_s10, %s965_s8 }
  0x44   : > { %p969_p10 = pneg %p968_p6  ;;  %p975_p4 = por %p974_p0, %p973_p9 }
  0x46   : > { %p976_p8 = pnand %p975_p4, %p969_p10 }
  0x48   : > { %979 = shalt.err (!%p976_p8)
}
  0x49   : > { %s1335_s7 = smov 8   ;;  %s1336_s15 = smov 128  }
  0x4a   : > { %836 = dma.hbm_to_vmem [thread:$0]  (!%p1197_p2), %s1193_s17, 256, %s1195_s19, %s1201_s30, %s1336_s15, %s1336_s15, %s1335_s7  }
  0x4b   : > { %p1337_p1 = scmp.ne.s32.totalorder %s1331_s29, 0 }
  0x4c   : > { %s1228_s12 = sand.u32 (!%p1337_p1), 1, %s1040_s22   ;;  %p1338_p4 = scmp.ne.s32.totalorder (!%p1337_p1), %s1329_s27, 0 }
  0x4d   : > { %259 = sbr.rel (%p1337_p1) target bundleno = 701 (0x2bd), region = 40  ;;  %s747_s13 = sshll.u32 (!%p1337_p1), %s1228_s12, 4 }
  0x4e   : > { %s262_s14 = scalar_lea.sflag (!%p1337_p1), [#allocation3], %s1228_s12  ;;  %s1234_s20 = scalar_lea.vmem (!%p1337_p1), [#allocation2], %s747_s13 }
  0x52   : > { %1023 = dma.done.wait (%p1338_p4), %s262_s14, 256  }
  0x53   : > { %1025 = vsyncadd (%p1338_p4), %s262_s14, 4294967040  ;;  %p1339_p6 = scmp.eq.s32.totalorder %s1117_s25, 0 }
  0x55   : > { %1027 = dma.done.wait (%p1339_p6), [#allocation6], 6144   ;;  %p1340_p8 = pmov %p1339_p6 }
  0x56   : > { %v332_v0 = vld [vmem:[#allocation5 + $0x78] sm:$0xff]  ;;  %v331_v1 = vld [vmem:[#allocation5 + $0x70] sm:$0xff]  ;;  %v330_v2 = vld [vmem:[#allocation5 + $0x68] sm:$0xff]  ;;  %v1057_v50 = vmov 0.0   ;;  %v451_v58 = vlaneseq  ;;  %s299_s30 = scalar_lea.vmem [#allocation8], %s747_s13  ;;  %s760_s16 = sshll.u32 %s1117_s25, 8 }
  0x57   : > { %1029 = vsyncadd (%p1340_p8), [#allocation6], 4294961152  ;;  %779 = vmatprep.subr.mxu0 %v332_v0  ;;  %v329_v3 = vld [vmem:[#allocation5 + $0x60] sm:$0xff]  ;;  %v328_v4 = vld [vmem:[#allocation5 + $0x58] sm:$0xff]  ;;  %525 = vmatprep.mubr.f32.mxu1 %v1057_v50  ;;  %s617_s18 = sshll.u32 %s299_s30, 4  ;;  %s1268_s7 = scalar_lea.hbm %s1321_s5, %s760_s16  ;;  %s1270_s18 = int_to_ptr.vmem [resolvable:$true] %s617_s18 }
  0x58   : > { %780 = vmatpush3.msra.mxu0 %v332_v0  ;;  %v1245_v5 = vld [vmem:[%s1234_s20] sm:$0xff]  ;;  %v448_v6 = vld [vmem:[#allocation7 + $0xf8] sm:$0xff]  ;;  %v446_v8 = vld [vmem:[#allocation7 + $0xe8] sm:$0xff]  ;;  %v452_v59 = vshrl.u32 %v451_v58, 7  ;;  %s599_s15 = scalar_lea.sflag [#allocation4], %s1228_s12  ;;  %s980_s13 = scalar_lea.vmem %s1270_s18, 256 }
  0x59   : > { %781 = vmatprep.subr.mxu0 %v331_v1  ;;  %811 = vmatprep.mubr.f32.mxu0 %v1245_v5  ;;  %v447_v7 = vld [vmem:[#allocation7 + $0xf0] sm:$0xff]  ;;  %v445_v9 = vld [vmem:[#allocation7 + $0xe0] sm:$0xff]  ;;  %v444_v11 = vld [vmem:[#allocation7 + $0xd8] sm:$0xff]  ;;  %p981_p0 = scmp.ne.s32.totalorder %s1270_s18, %s980_s13  ;;  %p1341_p2 = scmp.ne.s32.totalorder %s1333_s11, 0 }
  0x5a   : > { %782 = vmatpush3.msra.mxu0 %v331_v1  ;;  %461 = vmatprep.subr.mxu1 %v448_v6  ;;  %v327_v10 = vld [vmem:[#allocation5 + $0x50] sm:$0xff]  ;;  %v326_v13 = vld [vmem:[#allocation5 + $0x48] sm:$0xff]  ;;  %v441_v15 = vld [vmem:[#allocation7 + $0xc0] sm:$0xff]  ;;  %v457_v60 = vsub.s32 1, %v452_v59  ;;  %s1058_s14 = smov [#allocation8]  }
  0x5b   : > { %783 = vmatprep.subr.mxu0 %v330_v2  ;;  %462 = vmatpush1.msra.mxu1 %v447_v7  ;;  %v443_v12 = vld [vmem:[#allocation7 + $0xd0] sm:$0xff]  ;;  %v442_v14 = vld [vmem:[#allocation7 + $0xc8] sm:$0xff]  ;;  %v325_v16 = vld [vmem:[#allocation5 + $0x40] sm:$0xff]  ;;  %p982_p7 = pnand %p981_p0, %p1341_p2 }
  0x5c   : > { %784 = vmatpush3.msra.mxu0 %v330_v2  ;;  %463 = vmatprep.subr.mxu1 %v446_v8  ;;  %v440_v17 = vld [vmem:[#allocation7 + $0xb8] sm:$0xff]  ;;  %v439_v18 = vld [vmem:[#allocation7 + $0xb0] sm:$0xff]  ;;  %v438_v20 = vld [vmem:[#allocation7 + $0xa8] sm:$0xff] }
  0x5d   : > { %785 = vmatprep.subr.mxu0 %v329_v3  ;;  %464 = vmatpush1.msra.mxu1 %v445_v9  ;;  %v324_v19 = vld [vmem:[#allocation5 + $0x38] sm:$0xff]  ;;  %v437_v21 = vld [vmem:[#allocation7 + $0xa0] sm:$0xff]  ;;  %v323_v22 = vld [vmem:[#allocation5 + $0x30] sm:$0xff]  ;;  %p983_p11 = pneg %p982_p7 }
  0x5e   : > { %786 = vmatpush3.msra.mxu0 %v329_v3  ;;  %465 = vmatprep.subr.mxu1 %v444_v11  ;;  %v436_v23 = vld [vmem:[#allocation7 + $0x98] sm:$0xff]  ;;  %v435_v24 = vld [vmem:[#allocation7 + $0x90] sm:$0xff]  ;;  %v322_v25 = vld [vmem:[#allocation5 + $0x28] sm:$0xff] }
  0x5f   : > { %787 = vmatprep.subr.mxu0 %v328_v4  ;;  %466 = vmatpush1.msra.mxu1 %v443_v12  ;;  %v434_v26 = vld [vmem:[#allocation7 + $0x88] sm:$0xff]  ;;  %v433_v27 = vld [vmem:[#allocation7 + $0x80] sm:$0xff]  ;;  %v432_v29 = vld [vmem:[#allocation7 + $0x78] sm:$0xff] }
  0x60   : > { %788 = vmatpush3.msra.mxu0 %v328_v4  ;;  %467 = vmatprep.subr.mxu1 %v442_v14  ;;  %v321_v28 = vld [vmem:[#allocation5 + $0x20] sm:$0xff]  ;;  %v431_v30 = vld [vmem:[#allocation7 + $0x70] sm:$0xff]  ;;  %v320_v31 = vld [vmem:[#allocation5 + $0x18] sm:$0xff] }
  0x61   : > { %789 = vmatprep.subr.mxu0 %v327_v10  ;;  %468 = vmatpush1.msra.mxu1 %v441_v15  ;;  %v430_v32 = vld [vmem:[#allocation7 + $0x68] sm:$0xff]  ;;  %v429_v33 = vld [vmem:[#allocation7 + $0x60] sm:$0xff]  ;;  %v319_v34 = vld [vmem:[#allocation5 + $0x10] sm:$0xff]  ;;  %v453_v15 = vsub.s32 0, %v452_v59 }
  0x62   : > { %790 = vmatpush3.msra.mxu0 %v327_v10  ;;  %469 = vmatprep.subr.mxu1 %v440_v17  ;;  %v428_v35 = vld [vmem:[#allocation7 + $0x58] sm:$0xff]  ;;  %v427_v36 = vld [vmem:[#allocation7 + $0x50] sm:$0xff]  ;;  %v318_v37 = vld [vmem:[#allocation5 + $0x8] sm:$0xff] }
  0x63   : > { %791 = vmatprep.subr.mxu0 %v326_v13  ;;  %470 = vmatpush1.msra.mxu1 %v439_v18  ;;  %v426_v38 = vld [vmem:[#allocation7 + $0x48] sm:$0xff]  ;;  %v425_v39 = vld [vmem:[#allocation7 + $0x40] sm:$0xff]  ;;  %v424_v41 = vld [vmem:[#allocation7 + $0x38] sm:$0xff] }
  0x64   : > { %792 = vmatpush3.msra.mxu0 %v326_v13  ;;  %471 = vmatprep.subr.mxu1 %v438_v20  ;;  %v317_v40 = vld [vmem:[#allocation5] sm:$0xff]  ;;  %v1249_v42 = vld [vmem:[%s1234_s20 + $0x8] sm:$0xff]  ;;  %v423_v43 = vld [vmem:[#allocation7 + $0x30] sm:$0xff]  ;;  %s984_s20 = sshll.u32 %s1058_s14, 4  ;;  %s985_s20 = int_to_ptr.vmem [resolvable:$false] %s984_s20 }
  0x65   : > { %793 = vmatprep.subr.mxu0 %v325_v16  ;;  %472 = vmatpush1.msra.mxu1 %v437_v21  ;;  %v422_v44 = vld [vmem:[#allocation7 + $0x28] sm:$0xff]  ;;  %v421_v45 = vld [vmem:[#allocation7 + $0x20] sm:$0xff]  ;;  %v420_v46 = vld [vmem:[#allocation7 + $0x18] sm:$0xff]  ;;  %s986_s27 = scalar_lea.vmem %s985_s20, 512  ;;  %p987_p12 = scmp.lt.s32.totalorder %s1270_s18, %s985_s20 }
  0x66   : > { %794 = vmatpush3.msra.mxu0 %v325_v16  ;;  %473 = vmatprep.subr.mxu1 %v436_v23  ;;  %v419_v47 = vld [vmem:[#allocation7 + $0x10] sm:$0xff]  ;;  %v418_v48 = vld [vmem:[#allocation7 + $0x8] sm:$0xff]  ;;  %v417_v49 = vld [vmem:[#allocation7] sm:$0xff]  ;;  %p988_p13 = scmp.lt.s32.totalorder %s986_s27, %s980_s13 }
  0x67   : > { %795 = vmatprep.subr.mxu0 %v324_v19  ;;  %474 = vmatpush1.msra.mxu1 %v435_v24  ;;  %v753_v52 = vld [vmem:[%s1318_s2] ss:$0 sm:$0xff]  ;;  %v587_v24 = vand.u32 127, %v451_v58 }
  0x68   : > { %796 = vmatpush3.msra.mxu0 %v324_v19  ;;  %475 = vmatprep.subr.mxu1 %v434_v26  ;;  %v449_v61 = vld [vmem:[%s1320_s4] sm:$0x3]  ;;  %p989_p3 = por %p988_p13, %p987_p12 }
  0x69   : > { %797 = vmatprep.subr.mxu0 %v323_v22  ;;  %476 = vmatpush1.msra.mxu1 %v433_v27  ;;  %v458_v62 = vrot.slane %v449_v61, %v457_v60  ;;  %v454_v17 = vrot.slane %v449_v61, %v453_v15  ;;  %vm588_vm2 = vcmp.lt.s32.totalorder %v587_v24, 32 }
  0x6a   : > { %798 = vmatpush3.msra.mxu0 %v323_v22  ;;  %477 = vmatprep.subr.mxu1 %v432_v29  ;;  %p990_p5 = pnand %p989_p3, %p983_p11 }
  0x6b   : > { %799 = vmatprep.subr.mxu0 %v322_v25  ;;  %478 = vmatpush1.msra.mxu1 %v431_v30 }
  0x6c   : > { %800 = vmatpush3.msra.mxu0 %v322_v25  ;;  %479 = vmatprep.subr.mxu1 %v430_v32 }
  0x6d   : > { %801 = vmatprep.subr.mxu0 %v321_v28  ;;  %480 = vmatpush1.msra.mxu1 %v429_v33 }
  0x6e   : > { %802 = vmatpush3.msra.mxu0 %v321_v28  ;;  %481 = vmatprep.subr.mxu1 %v428_v35 }
  0x6f   : > { %803 = vmatprep.subr.mxu0 %v320_v31  ;;  %482 = vmatpush1.msra.mxu1 %v427_v36 }
  0x70   : > { %804 = vmatpush3.msra.mxu0 %v320_v31  ;;  %483 = vmatprep.subr.mxu1 %v426_v38 }
  0x71   : > { %805 = vmatprep.subr.mxu0 %v319_v34  ;;  %484 = vmatpush1.msra.mxu1 %v425_v39 }
  0x72   : > { %806 = vmatpush3.msra.mxu0 %v319_v34  ;;  %485 = vmatprep.subr.mxu1 %v424_v41 }
  0x73   : > { %807 = vmatprep.subr.mxu0 %v318_v37  ;;  %486 = vmatpush1.msra.mxu1 %v423_v43 }
  0x74   : > { %808 = vmatpush3.msra.mxu0 %v318_v37  ;;  %487 = vmatprep.subr.mxu1 %v422_v44 }
  0x75   : > { %809 = vmatprep.subr.mxu0 %v317_v40  ;;  %488 = vmatpush1.msra.mxu1 %v421_v45 }
  0x76   : > { %810 = vmatpush3.msra.mxu0 %v317_v40  ;;  %489 = vmatprep.subr.mxu1 %v420_v46 }
  0x77   : > { %812 = vmatmul.mubr.f32.vlgmr.msra.gmra.mxu0 %v1249_v42  ;;  %490 = vmatpush1.msra.mxu1 %v419_v47 }
  0x78   : > { %491 = vmatprep.subr.mxu1 %v418_v48 }
  0x79   : > { %492 = vmatpush1.msra.mxu1 %v417_v49 }
 0x137   : > { %v813_v51 = vpop.f32.mrf.mxu0 }
 0x138   : > { %v412_v55 = vadd.f32 %v813_v51, %v753_v52 }
 0x139   : > { %v406_v53 = vpop.f32.mrf.mxu0 }
 0x13a   : > { %v407_v54 = vadd.f32 %v753_v52, %v406_v53  ;;  %v416_v57 = vmax.f32 %v412_v55, 0.0 }
 0x13c   : > { %v415_v56 = vmax.f32 %v407_v54, 0.0 }
 0x13e   : > { %526 = vmatmul.mubr.f32.vlgmr.msra.gmra.mxu1 %v415_v56 }
 0x13f   : > { %531 = vmatprep.mubr.f32.mxu1 %v1057_v50 }
 0x142   : > { %532 = vmatmul.mubr.f32.gmra.mxu1 %v416_v57 }
 0x1fe   : > { %v527_v63 = vpop.f32.mrf.mxu1 }
 0x1ff   : > { %v528_v19 = vadd.f32 %v527_v63, %v454_v17 }
 0x200   : > { %v529_v0 = vpop.f32.mrf.mxu1 }
 0x201   : > { %v530_v1 = vadd.f32 %v529_v0, %v458_v62  ;;  %v556_v26 = vsub.f32 %v1245_v5, %v528_v19 }
 0x202   : > { %v533_v2 = vpop.f32.mrf.mxu1 }
 0x203   : > { %v538_v3 = vand.u32 2147483647, %v530_v1  ;;  %v534_v28 = vadd.f32 %v533_v2, %v454_v17  ;;  %vm550_vm0 = vcmp.ge.f32.partialorder %v530_v1, 0.0  ;;  %v564_v33 = vmin.f32 %v530_v1, 0.0 }
 0x204   : > { %v535_v4 = vpop.f32.mrf.mxu1 }
 0x205   : > { %v540_v6 = vsub.f32 0.0, %v538_v3  ;;  %v536_v7 = vadd.f32 %v535_v4, %v458_v62  ;;  %v557_v39 = vsub.f32 %v1249_v42, %v534_v28 }
 0x207   : > { %v542_v8 = vmul.f32 1.442695, %v540_v6  ;;  %v539_v9 = vand.u32 2147483647, %v536_v7  ;;  %vm551_vm3 = vcmp.ge.f32.partialorder %v536_v7, 0.0  ;;  %v565_v47 = vmin.f32 %v536_v7, 0.0 }
 0x209   : > { %888 = vpow2.f32 %v542_v8  ;;  %v541_v10 = vsub.f32 0.0, %v539_v9 }
 0x20b   : > { %v544_v11 = vmul.f32 1.442695, %v541_v10 }
 0x20d   : > { %890 = vpow2.f32 %v544_v11 }
 0x216   : > { %v889_v12 = vpop.eup %888 }
 0x217   : > { %v546_v13 = vadd.f32 1.0, %v889_v12  ;;  %v569_v18 = vmul.f32 -0.5, %v889_v12  ;;  %v572_v22 = vand.u32 2147483647, %v889_v12 }
 0x219   : > { %892 = vrcp.f32 %v546_v13  ;;  %v570_v20 = vadd.f32 1.0, %v569_v18  ;;  %vm573_vm1 = vcmp.lt.f32.partialorder %v572_v22, 0.0004427343 }
 0x21a   : > { %v891_v14 = vpop.eup %890  ;;  %894 = vlog2.f32 %v546_v13 }
 0x21b   : > { %v547_v16 = vadd.f32 1.0, %v891_v14  ;;  %v578_v21 = vmul.f32 -0.5, %v891_v14  ;;  %v571_v30 = vmul.f32 %v889_v12, %v570_v20  ;;  %v581_v34 = vand.u32 2147483647, %v891_v14 }
 0x21d   : > { %896 = vrcp.f32 %v547_v16  ;;  %v579_v31 = vadd.f32 1.0, %v578_v21  ;;  %vm582_vm4 = vcmp.lt.f32.partialorder %v581_v34, 0.0004427343 }
 0x21e   : > { %898 = vlog2.f32 %v547_v16 }
 0x21f   : > { %v580_v44 = vmul.f32 %v891_v14, %v579_v31 }
 0x226   : > { %v893_v23 = vpop.eup %892 }
 0x227   : > { %v895_v25 = vpop.eup %894  ;;  %v552_v27 = vmul.f32 %v893_v23, %v889_v12 }
 0x228   : > { %v568_v29 = vmul.f32 0.6931472, %v895_v25 }
 0x229   : > { %v554_v32 = vsel %vm550_vm0, %v893_v23, %v552_v27 }
 0x22a   : > { %v897_v35 = vpop.eup %896  ;;  %v558_v36 = vmul.f32 %v556_v26, %v554_v32  ;;  %v574_v37 = vsel %vm573_vm1, %v571_v30, %v568_v29 }
 0x22b   : > { %v899_v38 = vpop.eup %898  ;;  %v553_v40 = vmul.f32 %v897_v35, %v891_v14  ;;  %v584_v5 = vsub.f32 %v564_v33, %v574_v37 }
 0x22c   : > { %v560_v41 = vadd.f32 %v558_v36, %v528_v19  ;;  %v577_v43 = vmul.f32 0.6931472, %v899_v38 }
 0x22d   : > { %v555_v45 = vsel %vm551_vm3, %v897_v35, %v553_v40  ;;  %v589_v46 = vsel %vm588_vm2, %v584_v5, 0.0 }
 0x22e   : > { %562 = vst [vmem:[%s299_s30] sm:$0xff] %v560_v41  ;;  %v559_v48 = vmul.f32 %v557_v39, %v555_v45  ;;  %591 = vadd.xlane.f32.xlu0 %v589_v46  ;;  %v583_v42 = vsel %vm582_vm4, %v580_v44, %v577_v43 }
 0x22f   : > { %v585_v49 = vsub.f32 %v565_v47, %v583_v42 }
 0x230   : > { %v561_v50 = vadd.f32 %v559_v48, %v534_v28 }
 0x231   : > { %v590_v51 = vsel %vm588_vm2, %v585_v49, 0.0 }
 0x232   : > { %563 = vst [vmem:[%s299_s30 + $0x8] sm:$0xff] %v561_v50  ;;  %593 = vadd.xlane.f32.xlu0 %v590_v51 }
 0x233   : > { %993 = shalt.err (!%p990_p5)
}
 0x234   : > { %s994_s29 = scalar_lea.hbm %s1268_s7, 256  ;;  %s998_s30 = scalar_lea.hbm %s1321_s5, 1024 }
 0x235   : > { %p995_p10 = scmp.ne.s32.totalorder %s1268_s7, %s994_s29  ;;  %p999_p4 = scmp.lt.s32.totalorder %s1268_s7, %s1321_s5 }
 0x236   : > { %p1000_p6 = scmp.lt.s32.totalorder %s998_s30, %s994_s29 }
 0x237   : > { %p996_p9 = pnand %p995_p10, %p1341_p2 }
 0x238   : > { %p1001_p8 = por %p1000_p6, %p999_p4 }
 0x239   : > { %p997_p1 = pneg %p996_p9 }
 0x23b   : > { %p1002_p0 = pnand %p1001_p8, %p997_p1 }
 0x23d   : > { %1005 = shalt.err (!%p1002_p0)
}
 0x23e   : > { %s1059_s10 = smov 128   ;;  %s1060_s13 = smov 8   ;;  %vm595_vm5 = vcmask 7168  }
 0x23f   : > { %824 = dma.vmem_to_hbm [thread:$0]  (%p1341_p2), %s1270_s18, 256, %s1268_s7, %s599_s15, %s1059_s10, %s1059_s10, %s1060_s13  }
 0x240   : > { %s751_s14 = sshll.u32 %s1117_s25, 1 }
 0x241   : > { %p310_p7 = scmp.lt.s32.totalorder %s751_s14, 7 }
 0x243   : > { %s1348_s14 = smov (!%p310_p7, %s751_s14), 7 }
 0x244   : > { %s752_s20 = sshll.u32 %s1348_s14, 3 }
 0x245   : > { %s313_s29 = scalar_lea.vmem %s1322_s6, %s752_s20 }
 0x2b7   : > { %v592_v52 = vpop.xlane.xlu0 %591 }
 0x2b8   : > { %596 = vst.msk [vmem:[%s313_s29] sm:$0xff] %vm595_vm5, %v592_v52 }
 0x2bb   : > { %v594_v53 = vpop.xlane.xlu0 %593 }
 0x2bc   : > { %597 = vst.msk [vmem:[%s313_s29 + $0x8] sm:$0xff] %vm595_vm5, %v594_v53 }
 0x2bd PF: > { %p846_p11 = scmp.ge.s32.totalorder %s1048_s24, 2  ;;  %s636_s11 = sand.u32 1, %s1036_s21  }
 0x2be   : > { %p1342_p2 = scmp.ne.s32.totalorder %s1330_s28, 0  ;;  %s637_s25 = scalar_lea.sflag [#allocation4], %s636_s11 }
 0x2c0   : > { %p838_p12 = pnand %p846_p11, %p1342_p2 }
 0x2c2   : > { %p839_p13 = pneg %p838_p12 }
 0x2c4   : > { %1031 = dma.done.wait (%p839_p13), %s637_s25, 256  }
 0x2c5   : > { %1033 = vsyncadd (%p839_p13), %s637_s25, 4294967040  ;;  %p21_p3 = scmp.ge.s32.totalorder %s1170_s26, 6   ;;  %s1343_s21 = smov %s1040_s22 }
 0x2c6   : > { %s1344_s22 = smov %s1044_s23  ;;  %s1345_s23 = smov %s1179_s9 }
 0x2c7   : > { %s1346_s24 = smov %s1170_s26  ;;  %23 = sbr.rel (!%p21_p3) target bundleno = 6 (0x6), region = 105 }
 0x2cc   :  { %650 = vsyncpa [#allocation3], 1 }
 0x2cd   :  { %652 = vsyncpa [#allocation3 + $0x1], 1 }
 0x2ce   :  { %653 = vsyncpa [#allocation6], 1 }
 0x2cf   :  { %654 = vsyncpa [#allocation4], 1 }
 0x2d0   :  { %656 = vsyncpa [#allocation4 + $0x1], 1 }

// kernel: tpu_custom_call.1
= control target key start
LH: loop header
LB: loop body
LE: loop exit
PB: predicated region body
PF: predicated region fallthrough
CT: control target
= control target key end

     0   :  { %12 = vsyncpa [#allocation3], 0  ;;  %s1316_s0 = inlined_call_operand.hbm [shape: f32[64,128], index: 0, kind: input, shape index: {}]   ;;  %s1317_s1 = inlined_call_operand.hbm [shape: f32[128,128], index: 1, kind: input, shape index: {}]   ;;  %s1318_s2 = inlined_call_operand.vmem [shape: f32[1,128], index: 2, kind: input, shape index: {}]   ;;  %s1319_s3 = inlined_call_operand.hbm [shape: f32[128,256], index: 3, kind: input, shape index: {}]   ;;  %s1320_s4 = inlined_call_operand.vmem [shape: f32[1,256], index: 4, kind: input, shape index: {}]   ;;  %s1321_s5 = inlined_call_operand.hbm [shape: f32[64,128], index: 5, kind: output, shape index: {0}]   ;;  %s1322_s6 = inlined_call_operand.vmem [shape: f32[64,1], index: 6, kind: output, shape index: {1}]  }
   0x1   :  { %14 = vsyncpa [#allocation3 + $0x1], 0 }
   0x2   :  { %15 = vsyncpa [#allocation6], 0 }
   0x3   :  { %16 = vsyncpa [#allocation4], 0 }
   0x4   :  { %18 = vsyncpa [#allocation4 + $0x1], 0  ;;  %s1096_s21 = smov 0   ;;  %s1098_s22 = smov 0  }
   0x5   :  { %s1100_s23 = smov 0   ;;  %s1102_s24 = smov 0  }
   0x6 LB: > { %s1117_s25 = sadd.s32 4294967295, %s1048_s24   ;;  %s738_s26 = sadd.s32 4294967294, %s1048_s24   ;;  %s1048_s24 = sphi %s1102_s24, %s1346_s24   ;;  %s1044_s23 = sphi %s1100_s23, %s1345_s23   ;;  %s1040_s22 = sphi %s1098_s22, %s1344_s22   ;;  %s1036_s21 = sphi %s1096_s21, %s1343_s21  }
   0x7   : > { %p44_p0 = scmp.ne.s32.totalorder %s1040_s22, %s1036_s21  ;;  %p1323_p1 = scmp.eq.s32.totalorder %s1117_s25, 0 }
   0x8   : > { %p152_p2 = scmp.eq.s32.totalorder %s1117_s25, 3  ;;  %p158_p3 = scmp.eq.s32.totalorder %s738_s26, 3 }
   0x9   : > { %p1126_p4 = por %p1323_p1, %p44_p0  ;;  %p739_p5 = scmp.ge.s32.totalorder %s1048_s24, 1 }
   0xa   : > { %p1131_p6 = por %p158_p3, %p44_p0  ;;  %p191_p7 = scmp.lt.s32.totalorder %s1048_s24, 5 }
   0xb   : > { %s1329_s27 = scalar_select %p1126_p4, 1, 0 }
   0xc   : > { %s1330_s28 = scalar_select %p1131_p6, 1, 0 }
   0xd   : > { %p1136_p8 = pnand %p739_p5, %p191_p7  ;;  %s1050_s30 = smov [#allocation5]  }
   0xe   : > { %s203_s7 = sshll.u32 %s1050_s30, 4  ;;  %s1051_s9 = smov [#allocation7]   ;;  %s204_s7 = int_to_ptr.vmem [resolvable:$true] %s203_s7 }
   0xf   : > { %s1331_s29 = scalar_select %p1136_p8, 1, 0 }
  0x10   : > { %p826_p9 = pneg %p1136_p8  ;;  %s219_s10 = sshll.u32 %s1051_s9, 4  ;;  %s220_s10 = int_to_ptr.vmem [resolvable:$true] %s219_s10 }
  0x11   : > { %s911_s11 = scalar_lea.vmem %s204_s7, 2048  ;;  %p919_p3 = scmp.lt.s32.totalorder %s204_s7, %s204_s7 }
  0x12   : > { %p1144_p10 = pnand %p826_p9, %p1323_p1  ;;  %p912_p12 = scmp.ne.s32.totalorder %s204_s7, %s911_s11 }
  0x13   : > { %p920_p5 = scmp.lt.s32.totalorder %s911_s11, %s911_s11 }
  0x14   : > { %p902_p11 = pneg %p1144_p10 }
  0x15   : > { %p921_p7 = por %p920_p5, %p919_p3 }
  0x16   : > { %p914_p13 = pnand %p912_p12, %p902_p11 }
  0x18   : > { %p915_p0 = pneg %p914_p13 }
  0x1a   : > { %p922_p9 = pnand %p921_p7, %p915_p0 }
  0x1c   : > { %925 = shalt.err (!%p922_p9)
}
  0x1d   : > { %s1324_s12 = smov 128   ;;  %s1325_s13 = smov 8  }
  0x1e   : > { %829 = dma.hbm_to_vmem [thread:$0]  (!%p1144_p10), %s1317_s1, 2048, %s204_s7, [#allocation6], %s1324_s12, %s1324_s12, %s1325_s13  }
  0x1f   : > { %s937_s16 = scalar_lea.vmem %s220_s10, 4096  ;;  %p945_p0 = scmp.lt.s32.totalorder %s220_s10, %s220_s10 }
  0x20   : > { %p938_p12 = scmp.ne.s32.totalorder %s220_s10, %s937_s16  ;;  %p946_p5 = scmp.lt.s32.totalorder %s937_s16, %s937_s16 }
  0x22   : > { %p940_p13 = pnand %p938_p12, %p902_p11  ;;  %p947_p7 = por %p946_p5, %p945_p0 }
  0x24   : > { %p941_p3 = pneg %p940_p13 }
  0x26   : > { %p948_p9 = pnand %p947_p7, %p941_p3 }
  0x28   : > { %951 = shalt.err (!%p948_p9)
}
  0x29   : > { %s1054_s17 = smov 256   ;;  %s1055_s18 = smov 16  }
  0x2a   : > { %832 = dma.hbm_to_vmem [thread:$0]  (!%p1144_p10), %s1319_s3, 4096, %s220_s10, [#allocation6], %s1054_s17, %s1054_s17, %s1055_s18  }
  0x2b   : > { %s1170_s26 = sadd.s32 1, %s1048_s24   ;;  %s31_s7 = sadd.s32 1, %s1044_s23 }
  0x2c   : > { %s28_s30 = ssub.s32 %s1048_s24, %s1170_s26  ;;  %p38_p12 = scmp.ne.s32.totalorder %s1044_s23, %s1040_s22 }
  0x2d   : > { %p29_p11 = scmp.eq.s32.totalorder %s28_s30, 0  ;;  %p39_p13 = scmp.eq.s32.totalorder %s1048_s24, 0 }
  0x2e   : > { %p1183_p0 = por %p152_p2, %p38_p12  ;;  %p843_p5 = scmp.lt.s32.totalorder %s1048_s24, 4 }
  0x2f   : > { %s1179_s9 = scalar_select %p29_p11, %s1044_s23, %s31_s7  }
  0x30   : > { %p40_p3 = por %p39_p13, %p38_p12  ;;  %s236_s8 = sand.u32 1, %s1044_s23  }
  0x31   : > { %s1333_s11 = scalar_select %p1183_p0, 1, 0 }
  0x32   : > { %s743_s14 = sshll.u32 %s236_s8, 4  ;;  %s759_s10 = sshll.u32 %s1048_s24, 8 }
  0x33   : > { %s1193_s17 = scalar_lea.hbm %s1316_s0, %s759_s10  ;;  %s240_s18 = scalar_lea.vmem [#allocation2], %s743_s14 }
  0x34   : > { %s247_s19 = sshll.u32 %s240_s18, 4  ;;  %p1197_p2 = pnand %p843_p5, %p40_p3  ;;  %s1195_s19 = int_to_ptr.vmem [resolvable:$true] %s247_s19 }
  0x35   : > { %s1201_s30 = scalar_lea.sflag [#allocation3], %s236_s8  ;;  %s952_s7 = scalar_lea.hbm %s1193_s17, 256 }
  0x36   : > { %p953_p10 = scmp.ne.s32.totalorder %s1193_s17, %s952_s7  ;;  %p954_p7 = pneg %p1197_p2 }
  0x37   : > { %s957_s14 = scalar_lea.hbm %s1316_s0, 1024  ;;  %p958_p12 = scmp.lt.s32.totalorder %s1193_s17, %s1316_s0 }
  0x38   : > { %p955_p9 = pnand %p954_p7, %p953_p10  ;;  %p959_p13 = scmp.lt.s32.totalorder %s957_s14, %s952_s7 }
  0x3a   : > { %p956_p11 = pneg %p955_p9  ;;  %p960_p3 = por %p959_p13, %p958_p12 }
  0x3c   : > { %p961_p5 = pnand %p960_p3, %p956_p11 }
  0x3e   : > { %964 = shalt.err (!%p961_p5)
}
  0x3f   : > { %s965_s8 = scalar_lea.vmem %s1195_s19, 256  ;;  %s1056_s12 = smov [#allocation2]  }
  0x40   : > { %p966_p1 = scmp.ne.s32.totalorder %s1195_s19, %s965_s8  ;;  %s970_s13 = sshll.u32 %s1056_s12, 4  ;;  %s971_s13 = int_to_ptr.vmem [resolvable:$false] %s970_s13 }
  0x41   : > { %s972_s10 = scalar_lea.vmem %s971_s13, 512  ;;  %p973_p9 = scmp.lt.s32.totalorder %s1195_s19, %s971_s13 }
  0x42   : > { %p968_p6 = pnand %p966_p1, %p954_p7  ;;  %p974_p0 = scmp.lt.s32.totalorder %s972_s10, %s965_s8 }
  0x44   : > { %p969_p10 = pneg %p968_p6  ;;  %p975_p4 = por %p974_p0, %p973_p9 }
  0x46   : > { %p976_p8 = pnand %p975_p4, %p969_p10 }
  0x48   : > { %979 = shalt.err (!%p976_p8)
}
  0x49   : > { %s1335_s7 = smov 8   ;;  %s1336_s15 = smov 128  }
  0x4a   : > { %836 = dma.hbm_to_vmem [thread:$0]  (!%p1197_p2), %s1193_s17, 256, %s1195_s19, %s1201_s30, %s1336_s15, %s1336_s15, %s1335_s7  }
  0x4b   : > { %p1337_p1 = scmp.ne.s32.totalorder %s1331_s29, 0 }
  0x4c   : > { %s1228_s12 = sand.u32 (!%p1337_p1), 1, %s1040_s22   ;;  %p1338_p4 = scmp.ne.s32.totalorder (!%p1337_p1), %s1329_s27, 0 }
  0x4d   : > { %259 = sbr.rel (%p1337_p1) target bundleno = 701 (0x2bd), region = 40  ;;  %s747_s13 = sshll.u32 (!%p1337_p1), %s1228_s12, 4 }
  0x4e   : > { %s262_s14 = scalar_lea.sflag (!%p1337_p1), [#allocation3], %s1228_s12  ;;  %s1234_s20 = scalar_lea.vmem (!%p1337_p1), [#allocation2], %s747_s13 }
  0x52   : > { %1023 = dma.done.wait (%p1338_p4), %s262_s14, 256  }
  0x53   : > { %1025 = vsyncadd (%p1338_p4), %s262_s14, 4294967040  ;;  %p1339_p6 = scmp.eq.s32.totalorder %s1117_s25, 0 }
  0x55   : > { %1027 = dma.done.wait (%p1339_p6), [#allocation6], 6144   ;;  %p1340_p8 = pmov %p1339_p6 }
  0x56   : > { %v332_v0 = vld [vmem:[#allocation5 + $0x78] sm:$0xff]  ;;  %v331_v1 = vld [vmem:[#allocation5 + $0x70] sm:$0xff]  ;;  %v330_v2 = vld [vmem:[#allocation5 + $0x68] sm:$0xff]  ;;  %v1057_v50 = vmov 0.0   ;;  %v451_v58 = vlaneseq  ;;  %s299_s30 = scalar_lea.vmem [#allocation8], %s747_s13  ;;  %s760_s16 = sshll.u32 %s1117_s25, 8 }
  0x57   : > { %1029 = vsyncadd (%p1340_p8), [#allocation6], 4294961152  ;;  %779 = vmatprep.subr.mxu0 %v332_v0  ;;  %v329_v3 = vld [vmem:[#allocation5 + $0x60] sm:$0xff]  ;;  %v328_v4 = vld [vmem:[#allocation5 + $0x58] sm:$0xff]  ;;  %525 = vmatprep.mubr.f32.mxu1 %v1057_v50  ;;  %s617_s18 = sshll.u32 %s299_s30, 4  ;;  %s1268_s7 = scalar_lea.hbm %s1321_s5, %s760_s16  ;;  %s1270_s18 = int_to_ptr.vmem [resolvable:$true] %s617_s18 }
  0x58   : > { %780 = vmatpush3.msra.mxu0 %v332_v0  ;;  %v1245_v5 = vld [vmem:[%s1234_s20] sm:$0xff]  ;;  %v448_v6 = vld [vmem:[#allocation7 + $0xf8] sm:$0xff]  ;;  %v446_v8 = vld [vmem:[#allocation7 + $0xe8] sm:$0xff]  ;;  %v452_v59 = vshrl.u32 %v451_v58, 7  ;;  %s599_s15 = scalar_lea.sflag [#allocation4], %s1228_s12  ;;  %s980_s13 = scalar_lea.vmem %s1270_s18, 256 }
  0x59   : > { %781 = vmatprep.subr.mxu0 %v331_v1  ;;  %811 = vmatprep.mubr.f32.mxu0 %v1245_v5  ;;  %v447_v7 = vld [vmem:[#allocation7 + $0xf0] sm:$0xff]  ;;  %v445_v9 = vld [vmem:[#allocation7 + $0xe0] sm:$0xff]  ;;  %v444_v11 = vld [vmem:[#allocation7 + $0xd8] sm:$0xff]  ;;  %p981_p0 = scmp.ne.s32.totalorder %s1270_s18, %s980_s13  ;;  %p1341_p2 = scmp.ne.s32.totalorder %s1333_s11, 0 }
  0x5a   : > { %782 = vmatpush3.msra.mxu0 %v331_v1  ;;  %461 = vmatprep.subr.mxu1 %v448_v6  ;;  %v327_v10 = vld [vmem:[#allocation5 + $0x50] sm:$0xff]  ;;  %v326_v13 = vld [vmem:[#allocation5 + $0x48] sm:$0xff]  ;;  %v441_v15 = vld [vmem:[#allocation7 + $0xc0] sm:$0xff]  ;;  %v457_v60 = vsub.s32 1, %v452_v59  ;;  %s1058_s14 = smov [#allocation8]  }
  0x5b   : > { %783 = vmatprep.subr.mxu0 %v330_v2  ;;  %462 = vmatpush1.msra.mxu1 %v447_v7  ;;  %v443_v12 = vld [vmem:[#allocation7 + $0xd0] sm:$0xff]  ;;  %v442_v14 = vld [vmem:[#allocation7 + $0xc8] sm:$0xff]  ;;  %v325_v16 = vld [vmem:[#allocation5 + $0x40] sm:$0xff]  ;;  %p982_p7 = pnand %p981_p0, %p1341_p2 }
  0x5c   : > { %784 = vmatpush3.msra.mxu0 %v330_v2  ;;  %463 = vmatprep.subr.mxu1 %v446_v8  ;;  %v440_v17 = vld [vmem:[#allocation7 + $0xb8] sm:$0xff]  ;;  %v439_v18 = vld [vmem:[#allocation7 + $0xb0] sm:$0xff]  ;;  %v438_v20 = vld [vmem:[#allocation7 + $0xa8] sm:$0xff] }
  0x5d   : > { %785 = vmatprep.subr.mxu0 %v329_v3  ;;  %464 = vmatpush1.msra.mxu1 %v445_v9  ;;  %v324_v19 = vld [vmem:[#allocation5 + $0x38] sm:$0xff]  ;;  %v437_v21 = vld [vmem:[#allocation7 + $0xa0] sm:$0xff]  ;;  %v323_v22 = vld [vmem:[#allocation5 + $0x30] sm:$0xff]  ;;  %p983_p11 = pneg %p982_p7 }
  0x5e   : > { %786 = vmatpush3.msra.mxu0 %v329_v3  ;;  %465 = vmatprep.subr.mxu1 %v444_v11  ;;  %v436_v23 = vld [vmem:[#allocation7 + $0x98] sm:$0xff]  ;;  %v435_v24 = vld [vmem:[#allocation7 + $0x90] sm:$0xff]  ;;  %v322_v25 = vld [vmem:[#allocation5 + $0x28] sm:$0xff] }
  0x5f   : > { %787 = vmatprep.subr.mxu0 %v328_v4  ;;  %466 = vmatpush1.msra.mxu1 %v443_v12  ;;  %v434_v26 = vld [vmem:[#allocation7 + $0x88] sm:$0xff]  ;;  %v433_v27 = vld [vmem:[#allocation7 + $0x80] sm:$0xff]  ;;  %v432_v29 = vld [vmem:[#allocation7 + $0x78] sm:$0xff] }
  0x60   : > { %788 = vmatpush3.msra.mxu0 %v328_v4  ;;  %467 = vmatprep.subr.mxu1 %v442_v14  ;;  %v321_v28 = vld [vmem:[#allocation5 + $0x20] sm:$0xff]  ;;  %v431_v30 = vld [vmem:[#allocation7 + $0x70] sm:$0xff]  ;;  %v320_v31 = vld [vmem:[#allocation5 + $0x18] sm:$0xff] }
  0x61   : > { %789 = vmatprep.subr.mxu0 %v327_v10  ;;  %468 = vmatpush1.msra.mxu1 %v441_v15  ;;  %v430_v32 = vld [vmem:[#allocation7 + $0x68] sm:$0xff]  ;;  %v429_v33 = vld [vmem:[#allocation7 + $0x60] sm:$0xff]  ;;  %v319_v34 = vld [vmem:[#allocation5 + $0x10] sm:$0xff]  ;;  %v453_v15 = vsub.s32 0, %v452_v59 }
  0x62   : > { %790 = vmatpush3.msra.mxu0 %v327_v10  ;;  %469 = vmatprep.subr.mxu1 %v440_v17  ;;  %v428_v35 = vld [vmem:[#allocation7 + $0x58] sm:$0xff]  ;;  %v427_v36 = vld [vmem:[#allocation7 + $0x50] sm:$0xff]  ;;  %v318_v37 = vld [vmem:[#allocation5 + $0x8] sm:$0xff] }
  0x63   : > { %791 = vmatprep.subr.mxu0 %v326_v13  ;;  %470 = vmatpush1.msra.mxu1 %v439_v18  ;;  %v426_v38 = vld [vmem:[#allocation7 + $0x48] sm:$0xff]  ;;  %v425_v39 = vld [vmem:[#allocation7 + $0x40] sm:$0xff]  ;;  %v424_v41 = vld [vmem:[#allocation7 + $0x38] sm:$0xff] }
  0x64   : > { %792 = vmatpush3.msra.mxu0 %v326_v13  ;;  %471 = vmatprep.subr.mxu1 %v438_v20  ;;  %v317_v40 = vld [vmem:[#allocation5] sm:$0xff]  ;;  %v1249_v42 = vld [vmem:[%s1234_s20 + $0x8] sm:$0xff]  ;;  %v423_v43 = vld [vmem:[#allocation7 + $0x30] sm:$0xff]  ;;  %s984_s20 = sshll.u32 %s1058_s14, 4  ;;  %s985_s20 = int_to_ptr.vmem [resolvable:$false] %s984_s20 }
  0x65   : > { %793 = vmatprep.subr.mxu0 %v325_v16  ;;  %472 = vmatpush1.msra.mxu1 %v437_v21  ;;  %v422_v44 = vld [vmem:[#allocation7 + $0x28] sm:$0xff]  ;;  %v421_v45 = vld [vmem:[#allocation7 + $0x20] sm:$0xff]  ;;  %v420_v46 = vld [vmem:[#allocation7 + $0x18] sm:$0xff]  ;;  %s986_s27 = scalar_lea.vmem %s985_s20, 512  ;;  %p987_p12 = scmp.lt.s32.totalorder %s1270_s18, %s985_s20 }
  0x66   : > { %794 = vmatpush3.msra.mxu0 %v325_v16  ;;  %473 = vmatprep.subr.mxu1 %v436_v23  ;;  %v419_v47 = vld [vmem:[#allocation7 + $0x10] sm:$0xff]  ;;  %v418_v48 = vld [vmem:[#allocation7 + $0x8] sm:$0xff]  ;;  %v417_v49 = vld [vmem:[#allocation7] sm:$0xff]  ;;  %p988_p13 = scmp.lt.s32.totalorder %s986_s27, %s980_s13 }
  0x67   : > { %795 = vmatprep.subr.mxu0 %v324_v19  ;;  %474 = vmatpush1.msra.mxu1 %v435_v24  ;;  %v753_v52 = vld [vmem:[%s1318_s2] ss:$0 sm:$0xff]  ;;  %v587_v24 = vand.u32 127, %v451_v58 }
  0x68   : > { %796 = vmatpush3.msra.mxu0 %v324_v19  ;;  %475 = vmatprep.subr.mxu1 %v434_v26  ;;  %v449_v61 = vld [vmem:[%s1320_s4] sm:$0x3]  ;;  %p989_p3 = por %p988_p13, %p987_p12 }
  0x69   : > { %797 = vmatprep.subr.mxu0 %v323_v22  ;;  %476 = vmatpush1.msra.mxu1 %v433_v27  ;;  %v458_v62 = vrot.slane %v449_v61, %v457_v60  ;;  %v454_v17 = vrot.slane %v449_v61, %v453_v15  ;;  %vm588_vm2 = vcmp.lt.s32.totalorder %v587_v24, 32 }
  0x6a   : > { %798 = vmatpush3.msra.mxu0 %v323_v22  ;;  %477 = vmatprep.subr.mxu1 %v432_v29  ;;  %p990_p5 = pnand %p989_p3, %p983_p11 }
  0x6b   : > { %799 = vmatprep.subr.mxu0 %v322_v25  ;;  %478 = vmatpush1.msra.mxu1 %v431_v30 }
  0x6c   : > { %800 = vmatpush3.msra.mxu0 %v322_v25  ;;  %479 = vmatprep.subr.mxu1 %v430_v32 }
  0x6d   : > { %801 = vmatprep.subr.mxu0 %v321_v28  ;;  %480 = vmatpush1.msra.mxu1 %v429_v33 }
  0x6e   : > { %802 = vmatpush3.msra.mxu0 %v321_v28  ;;  %481 = vmatprep.subr.mxu1 %v428_v35 }
  0x6f   : > { %803 = vmatprep.subr.mxu0 %v320_v31  ;;  %482 = vmatpush1.msra.mxu1 %v427_v36 }
  0x70   : > { %804 = vmatpush3.msra.mxu0 %v320_v31  ;;  %483 = vmatprep.subr.mxu1 %v426_v38 }
  0x71   : > { %805 = vmatprep.subr.mxu0 %v319_v34  ;;  %484 = vmatpush1.msra.mxu1 %v425_v39 }
  0x72   : > { %806 = vmatpush3.msra.mxu0 %v319_v34  ;;  %485 = vmatprep.subr.mxu1 %v424_v41 }
  0x73   : > { %807 = vmatprep.subr.mxu0 %v318_v37  ;;  %486 = vmatpush1.msra.mxu1 %v423_v43 }
  0x74   : > { %808 = vmatpush3.msra.mxu0 %v318_v37  ;;  %487 = vmatprep.subr.mxu1 %v422_v44 }
  0x75   : > { %809 = vmatprep.subr.mxu0 %v317_v40  ;;  %488 = vmatpush1.msra.mxu1 %v421_v45 }
  0x76   : > { %810 = vmatpush3.msra.mxu0 %v317_v40  ;;  %489 = vmatprep.subr.mxu1 %v420_v46 }
  0x77   : > { %812 = vmatmul.mubr.f32.vlgmr.msra.gmra.mxu0 %v1249_v42  ;;  %490 = vmatpush1.msra.mxu1 %v419_v47 }
  0x78   : > { %491 = vmatprep.subr.mxu1 %v418_v48 }
  0x79   : > { %492 = vmatpush1.msra.mxu1 %v417_v49 }
 0x137   : > { %v813_v51 = vpop.f32.mrf.mxu0 }
 0x138   : > { %v412_v55 = vadd.f32 %v813_v51, %v753_v52 }
 0x139   : > { %v406_v53 = vpop.f32.mrf.mxu0 }
 0x13a   : > { %v407_v54 = vadd.f32 %v753_v52, %v406_v53  ;;  %v416_v57 = vmax.f32 %v412_v55, 0.0 }
 0x13c   : > { %v415_v56 = vmax.f32 %v407_v54, 0.0 }
 0x13e   : > { %526 = vmatmul.mubr.f32.vlgmr.msra.gmra.mxu1 %v415_v56 }
 0x13f   : > { %531 = vmatprep.mubr.f32.mxu1 %v1057_v50 }
 0x142   : > { %532 = vmatmul.mubr.f32.gmra.mxu1 %v416_v57 }
 0x1fe   : > { %v527_v63 = vpop.f32.mrf.mxu1 }
 0x1ff   : > { %v528_v19 = vadd.f32 %v527_v63, %v454_v17 }
 0x200   : > { %v529_v0 = vpop.f32.mrf.mxu1 }
 0x201   : > { %v530_v1 = vadd.f32 %v529_v0, %v458_v62  ;;  %v556_v26 = vsub.f32 %v1245_v5, %v528_v19 }
 0x202   : > { %v533_v2 = vpop.f32.mrf.mxu1 }
 0x203   : > { %v538_v3 = vand.u32 2147483647, %v530_v1  ;;  %v534_v28 = vadd.f32 %v533_v2, %v454_v17  ;;  %vm550_vm0 = vcmp.ge.f32.partialorder %v530_v1, 0.0  ;;  %v564_v33 = vmin.f32 %v530_v1, 0.0 }
 0x204   : > { %v535_v4 = vpop.f32.mrf.mxu1 }
 0x205   : > { %v540_v6 = vsub.f32 0.0, %v538_v3  ;;  %v536_v7 = vadd.f32 %v535_v4, %v458_v62  ;;  %v557_v39 = vsub.f32 %v1249_v42, %v534_v28 }
 0x207   : > { %v542_v8 = vmul.f32 1.442695, %v540_v6  ;;  %v539_v9 = vand.u32 2147483647, %v536_v7  ;;  %vm551_vm3 = vcmp.ge.f32.partialorder %v536_v7, 0.0  ;;  %v565_v47 = vmin.f32 %v536_v7, 0.0 }
 0x209   : > { %888 = vpow2.f32 %v542_v8  ;;  %v541_v10 = vsub.f32 0.0, %v539_v9 }
 0x20b   : > { %v544_v11 = vmul.f32 1.442695, %v541_v10 }
 0x20d   : > { %890 = vpow2.f32 %v544_v11 }
 0x216   : > { %v889_v12 = vpop.eup %888 }
 0x217   : > { %v546_v13 = vadd.f32 1.0, %v889_v12  ;;  %v569_v18 = vmul.f32 -0.5, %v889_v12  ;;  %v572_v22 = vand.u32 2147483647, %v889_v12 }
 0x219   : > { %892 = vrcp.f32 %v546_v13  ;;  %v570_v20 = vadd.f32 1.0, %v569_v18  ;;  %vm573_vm1 = vcmp.lt.f32.partialorder %v572_v22, 0.0004427343 }
 0x21a   : > { %v891_v14 = vpop.eup %890  ;;  %894 = vlog2.f32 %v546_v13 }
 0x21b   : > { %v547_v16 = vadd.f32 1.0, %v891_v14  ;;  %v578_v21 = vmul.f32 -0.5, %v891_v14  ;;  %v571_v30 = vmul.f32 %v889_v12, %v570_v20  ;;  %v581_v34 = vand.u32 2147483647, %v891_v14 }
 0x21d   : > { %896 = vrcp.f32 %v547_v16  ;;  %v579_v31 = vadd.f32 1.0, %v578_v21  ;;  %vm582_vm4 = vcmp.lt.f32.partialorder %v581_v34, 0.0004427343 }
 0x21e   : > { %898 = vlog2.f32 %v547_v16 }
 0x21f   : > { %v580_v44 = vmul.f32 %v891_v14, %v579_v31 }
 0x226   : > { %v893_v23 = vpop.eup %892 }
 0x227   : > { %v895_v25 = vpop.eup %894  ;;  %v552_v27 = vmul.f32 %v893_v23, %v889_v12 }
 0x228   : > { %v568_v29 = vmul.f32 0.6931472, %v895_v25 }
 0x229   : > { %v554_v32 = vsel %vm550_vm0, %v893_v23, %v552_v27 }
 0x22a   : > { %v897_v35 = vpop.eup %896  ;;  %v558_v36 = vmul.f32 %v556_v26, %v554_v32  ;;  %v574_v37 = vsel %vm573_vm1, %v571_v30, %v568_v29 }
 0x22b   : > { %v899_v38 = vpop.eup %898  ;;  %v553_v40 = vmul.f32 %v897_v35, %v891_v14  ;;  %v584_v5 = vsub.f32 %v564_v33, %v574_v37 }
 0x22c   : > { %v560_v41 = vadd.f32 %v558_v36, %v528_v19  ;;  %v577_v43 = vmul.f32 0.6931472, %v899_v38 }
 0x22d   : > { %v555_v45 = vsel %vm551_vm3, %v897_v35, %v553_v40  ;;  %v589_v46 = vsel %vm588_vm2, %v584_v5, 0.0 }
 0x22e   : > { %562 = vst [vmem:[%s299_s30] sm:$0xff] %v560_v41  ;;  %v559_v48 = vmul.f32 %v557_v39, %v555_v45  ;;  %591 = vadd.xlane.f32.xlu0 %v589_v46  ;;  %v583_v42 = vsel %vm582_vm4, %v580_v44, %v577_v43 }
 0x22f   : > { %v585_v49 = vsub.f32 %v565_v47, %v583_v42 }
 0x230   : > { %v561_v50 = vadd.f32 %v559_v48, %v534_v28 }
 0x231   : > { %v590_v51 = vsel %vm588_vm2, %v585_v49, 0.0 }
 0x232   : > { %563 = vst [vmem:[%s299_s30 + $0x8] sm:$0xff] %v561_v50  ;;  %593 = vadd.xlane.f32.xlu0 %v590_v51 }
 0x233   : > { %993 = shalt.err (!%p990_p5)
}
 0x234   : > { %s994_s29 = scalar_lea.hbm %s1268_s7, 256  ;;  %s998_s30 = scalar_lea.hbm %s1321_s5, 1024 }
 0x235   : > { %p995_p10 = scmp.ne.s32.totalorder %s1268_s7, %s994_s29  ;;  %p999_p4 = scmp.lt.s32.totalorder %s1268_s7, %s1321_s5 }
 0x236   : > { %p1000_p6 = scmp.lt.s32.totalorder %s998_s30, %s994_s29 }
 0x237   : > { %p996_p9 = pnand %p995_p10, %p1341_p2 }
 0x238   : > { %p1001_p8 = por %p1000_p6, %p999_p4 }
 0x239   : > { %p997_p1 = pneg %p996_p9 }
 0x23b   : > { %p1002_p0 = pnand %p1001_p8, %p997_p1 }
 0x23d   : > { %1005 = shalt.err (!%p1002_p0)
}
 0x23e   : > { %s1059_s10 = smov 128   ;;  %s1060_s13 = smov 8   ;;  %vm595_vm5 = vcmask 7168  }
 0x23f   : > { %824 = dma.vmem_to_hbm [thread:$0]  (%p1341_p2), %s1270_s18, 256, %s1268_s7, %s599_s15, %s1059_s10, %s1059_s10, %s1060_s13  }
 0x240   : > { %s751_s14 = sshll.u32 %s1117_s25, 1 }
 0x241   : > { %p310_p7 = scmp.lt.s32.totalorder %s751_s14, 7 }
 0x243   : > { %s1348_s14 = smov (!%p310_p7, %s751_s14), 7 }
 0x244   : > { %s752_s20 = sshll.u32 %s1348_s14, 3 }
 0x245   : > { %s313_s29 = scalar_lea.vmem %s1322_s6, %s752_s20 }
 0x2b7   : > { %v592_v52 = vpop.xlane.xlu0 %591 }
 0x2b8   : > { %596 = vst.msk [vmem:[%s313_s29] sm:$0xff] %vm595_vm5, %v592_v52 }
 0x2bb   : > { %v594_v53 = vpop.xlane.xlu0 %593 }
 0x2bc   : > { %597 = vst.msk [vmem:[%s313_s29 + $0x8] sm:$0xff] %vm595_vm5, %v594_v53 }
 0x2bd PF: > { %p846_p11 = scmp.ge.s32.totalorder %s1048_s24, 2  ;;  %s636_s11 = sand.u32 1, %s1036_s21  }
 0x2be   : > { %p1342_p2 = scmp.ne.s32.totalorder %s1330_s28, 0  ;;  %s637_s25 = scalar_lea.sflag [#allocation4], %s636_s11 }
 0x2c0   : > { %p838_p12 = pnand %p846_p11, %p1342_p2 }
 0x2c2   : > { %p839_p13 = pneg %p838_p12 }
 0x2c4   : > { %1031 = dma.done.wait (%p839_p13), %s637_s25, 256  }
 0x2c5   : > { %1033 = vsyncadd (%p839_p13), %s637_s25, 4294967040  ;;  %p21_p3 = scmp.ge.s32.totalorder %s1170_s26, 6   ;;  %s1343_s21 = smov %s1040_s22 }
 0x2c6   : > { %s1344_s22 = smov %s1044_s23  ;;  %s1345_s23 = smov %s1179_s9 }
 0x2c7   : > { %s1346_s24 = smov %s1170_s26  ;;  %23 = sbr.rel (!%p21_p3) target bundleno = 6 (0x6), region = 105 }
 0x2cc   :  { %650 = vsyncpa [#allocation3], 1 }
 0x2cd   :  { %652 = vsyncpa [#allocation3 + $0x1], 1 }
 0x2ce   :  { %653 = vsyncpa [#allocation6], 1 }
 0x2cf   :  { %654 = vsyncpa [#allocation4], 1 }
 0x2d0   :  { %656 = vsyncpa [#allocation4 + $0x1], 1 }

</bundles_post_ra>
